<compile_context>
chip_gen: v6e
topology: v6e:2x2x1
jax: 0.10.0
libtpu: 0.0.40
codegen_flags: <defaults>
</compile_context>

<pallas_src>
import math

import jax
import jax.numpy as jnp
from jax.experimental import pallas as pl
from jax.experimental.pallas import tpu as pltpu


def _round_up(a, m):
    return ((a + m - 1) // m) * m


def _combine_factors(ws, factors, max_combined=256):
    """Kron-combine consecutive factors into groups of size <= max_combined.

    Running the original per-factor loop over the grouped weights is exactly
    equivalent to running it over the original weights (kron associativity),
    but each grouped step is an MXU-friendly wide matmul.  Later factors in
    the list are the *slower* Kronecker digits, hence kron(w_later, cur).
    """
    groups = []
    cur_f, cur_w = None, None
    for f, w in zip(factors, ws):
        if cur_w is None:
            cur_f, cur_w = f, w
        elif cur_f * f <= max_combined:
            cur_w = jnp.kron(w, cur_w)
            cur_f = cur_f * f
        else:
            groups.append(cur_w)
            cur_f, cur_w = f, w
    groups.append(cur_w)
    return groups


def _make_kernel(num_groups):
    def kernel(x_ref, *refs):
        w_refs = refs[:num_groups]
        o_ref = refs[num_groups]

        if num_groups == 1:
            # out = x @ W  -- single lane-dense MXU matmul; output is already
            # in the final (B, state_size) layout (no transposes at all).
            o_ref[...] = jnp.dot(
                x_ref[...], w_refs[0][...],
                preferred_element_type=jnp.float32,
            ).astype(o_ref.dtype)
        else:
            # Fallback for state_size > max_combined: replicate the reference
            # loop on the VMEM-resident batch tile.  The transform is
            # row-separable, so using the tile's row count as "B" is exact.
            # All intermediates stay in VMEM within this single invocation.
            tb = x_ref.shape[0]
            y = x_ref[...]
            for w_ref in w_refs:
                f = w_ref.shape[0]
                y = y.reshape(-1, f)
                # w.T @ y.T expressed as one dot_general (no explicit transposes).
                y = jax.lax.dot_general(
                    w_ref[...], y,
                    dimension_numbers=(((0,), (1,)), ((), ())),
                    preferred_element_type=jnp.float32,
                ).astype(x_ref.dtype)
            o_ref[...] = y.reshape(-1, tb).T.astype(o_ref.dtype)

    return kernel


def l2_forward(x, ws, factors, *, max_combined=256, tile_b=512):
    """Pallas implementation of L2.forward (single fused kernel)."""
    S = math.prod(factors)
    B = x.size // S
    x2d = x.reshape(B, S)

    gws = _combine_factors(ws, factors, max_combined)
    m = len(gws)

    # Batch tile: biggest tile that keeps (x tile + out tile + fallback
    # intermediates), double-buffered, comfortably inside scoped VMEM.
    budget_bytes = (4 if m == 1 else 2) * 1024 * 1024
    row_bytes = S * x2d.dtype.itemsize
    fit_rows = max(8, budget_bytes // max(1, row_bytes))
    tile_b = max(8, min(tile_b, (fit_rows // 8) * 8))

    if B <= tile_b:
        TB, Bp = B, B                      # single block; full-dim block is legal
    else:
        TB = tile_b                        # multiple of 8
        Bp = _round_up(B, TB)
    if Bp != B:
        x2d = jnp.pad(x2d, ((0, Bp - B), (0, 0)))

    in_specs = [pl.BlockSpec((TB, S), lambda i: (i, 0))]
    for w in gws:
        f = int(w.shape[0])
        # Same block index for every grid step -> weight stays VMEM-resident.
        in_specs.append(pl.BlockSpec((f, f), lambda i: (0, 0)))

    flops = sum(2 * Bp * S * int(w.shape[0]) for w in gws)
    bytes_accessed = (2 * Bp * S + sum(int(w.size) for w in gws)) * x2d.dtype.itemsize

    out = pl.pallas_call(
        _make_kernel(m),
        out_shape=jax.ShapeDtypeStruct((Bp, S), x2d.dtype),
        grid=(Bp // TB,),
        in_specs=in_specs,
        out_specs=pl.BlockSpec((TB, S), lambda i: (i, 0)),
        compiler_params=pltpu.CompilerParams(
            dimension_semantics=("parallel",),
            vmem_limit_bytes=32 * 1024 * 1024,
        ),
        cost_estimate=pl.CostEstimate(
            flops=flops, transcendentals=0, bytes_accessed=bytes_accessed),
    )(x2d, *gws)

    return out[:B] if Bp != B else out


def l2_reference(x, ws, factors):
    """Pure-JAX reference mirroring the PyTorch code line by line."""
    state_size = math.prod(factors)
    B = x.size // state_size
    for w in ws:
        x = x.reshape(-1, w.shape[0])
        x = w.T @ x.T
    return x.reshape(-1, B).T


def make_params(factors, key):
    """Deterministically build the flat W vector and split it like __init__."""
    total = sum(f * f for f in factors)
    W_flat = jax.random.normal(key, (total,), dtype=jnp.float32) * 0.1
    ws = []
    acc = 0
    for f in factors:
        ws.append(W_flat[acc:acc + f * f].reshape(f, f))
        acc += f * f
    return W_flat, ws


if __name__ == "__main__":
    factors = (8, 16)                 # state_size = 128
    state_size = math.prod(factors)
    B = 2

    key = jax.random.PRNGKey(0)
    kx, kw = jax.random.split(key)
    x = jax.random.normal(kx, (B, state_size), dtype=jnp.float32)
    _, ws = make_params(factors, kw)

    out = jax.block_until_ready(l2_forward(x, ws, factors))

    ref = l2_reference(x, ws, factors)
    assert out.shape == (B, state_size), out.shape
    # Tolerance covers possible differing MXU precision paths between the
    # fused kron-combined matmul and the chained reference; structural errors
    # (wrong ordering/permutation) would be ~100x larger than this.
    max_err = float(jnp.max(jnp.abs(out - ref)))
    assert jnp.allclose(out, ref, atol=5e-3, rtol=5e-3), f"mismatch: {max_err}"

    print("KERNEL_OK")
</pallas_src>

<mosaic_0001>
module attributes {stable_mosaic.version = 11 : i64} {
  func.func @kernel(%arg0: i32, %arg1: memref<2x128xf32, #tpu.memory_space<vmem>>, %arg2: memref<128x128xf32, #tpu.memory_space<vmem>>, %arg3: memref<2x128xf32, #tpu.memory_space<vmem>>) attributes {dimension_semantics = [#tpu.dimension_semantics<parallel>], iteration_bounds = array<i64: 1>, scalar_prefetch = 0 : i64, scratch_operands = 0 : i64, tpu.core_type = #tpu.core_type<tc>, window_params = [{transform_indices = @transform_0, window_bounds = array<i64: 2, 128>}, {pipeline_mode = #tpu.pipeline_mode<synchronous>, transform_indices = @transform_1, window_bounds = array<i64: 128, 128>}, {transform_indices = @transform_2, window_bounds = array<i64: 2, 128>}]} {
    %c0 = arith.constant 0 : index
    %c0_0 = arith.constant 0 : index
    %0 = vector.load %arg1[%c0, %c0_0] : memref<2x128xf32, #tpu.memory_space<vmem>>, vector<2x128xf32>
    %c0_1 = arith.constant 0 : index
    %c0_2 = arith.constant 0 : index
    %1 = vector.load %arg2[%c0_1, %c0_2] : memref<128x128xf32, #tpu.memory_space<vmem>>, vector<128x128xf32>
    %cst = arith.constant dense<0.000000e+00> : vector<2x128xf32>
    %2 = tpu.matmul %0, %1, %cst {dimension_numbers = #tpu.dot_dimension_numbers<[1], [0], [0], [1], [0, 0, 1, 1], [], []>} : vector<2x128xf32>, vector<128x128xf32>, vector<2x128xf32> -> vector<2x128xf32>
    %c0_3 = arith.constant 0 : index
    %c0_4 = arith.constant 0 : index
    %3 = vector.load %arg3[%c0_3, %c0_4] : memref<2x128xf32, #tpu.memory_space<vmem>>, vector<2x128xf32>
    tpu.vector_store %arg3[%c0_3, %c0_4], %2 {strides = array<i32>} : memref<2x128xf32, #tpu.memory_space<vmem>>, vector<2x128xf32>,
    return
  }
  func.func @transform_0(%arg0: i32) -> (i32, i32) {
    %c0_i32 = arith.constant 0 : i32
    %c0_i32_0 = arith.constant 0 : i32
    return %arg0, %c0_i32 : i32, i32
  }
  func.func @transform_1(%arg0: i32) -> (i32, i32) {
    %c0_i32 = arith.constant 0 : i32
    %c0_i32_0 = arith.constant 0 : i32
    %c0_i32_1 = arith.constant 0 : i32
    return %c0_i32, %c0_i32_0 : i32, i32
  }
  func.func @transform_2(%arg0: i32) -> (i32, i32) {
    %c0_i32 = arith.constant 0 : i32
    %c0_i32_0 = arith.constant 0 : i32
    return %arg0, %c0_i32 : i32, i32
  }
}

</mosaic_0001>

<bundles_post_ra>
// kernel: tpu_custom_call.1
= control target key start
LH: loop header
LB: loop body
LE: loop exit
PB: predicated region body
PF: predicated region fallthrough
CT: control target
= control target key end

     0   :  { %7 = vsyncpa [#allocation3], 0  ;;  %s298_s0 = inlined_call_operand.hbm [shape: f32[2,128], index: 0, kind: input, shape index: {}]   ;;  %s299_s1 = inlined_call_operand.hbm [shape: f32[128,128], index: 1, kind: input, shape index: {}]   ;;  %s300_s2 = inlined_call_operand.hbm [shape: f32[2,128], index: 2, kind: output, shape index: {}]  }
   0x1   :  { %8 = vsyncpa [#allocation6], 0 }
   0x2   :  { %9 = vsyncpa [#allocation4], 0  ;;  %s267_s9 = smov [#allocation2]   ;;  %s268_s11 = smov [#allocation5]  }
   0x3   :  { %s16_s10 = sshll.u32 %s267_s9, 4  ;;  %s25_s12 = sshll.u32 %s268_s11, 4  ;;  %s17_s10 = int_to_ptr.vmem [resolvable:$true] %s16_s10  ;;  %s26_s12 = int_to_ptr.vmem [resolvable:$true] %s25_s12 }
   0x4   :  { %s209_s13 = scalar_lea.vmem %s17_s10, 32  ;;  %p214_p1 = scmp.lt.s32.totalorder %s17_s10, %s17_s10 }
   0x5   :  { %p210_p0 = scmp.ne.s32.totalorder %s17_s10, %s209_s13  ;;  %p215_p2 = scmp.lt.s32.totalorder %s209_s13, %s209_s13 }
   0x7   :  { %p216_p3 = por %p215_p2, %p214_p1 }
   0x9   :  { %p217_p4 = pnand %p216_p3, %p210_p0 }
   0xb   :  { %220 = shalt.err (!%p217_p4)
}
   0xc   :  { %19 = dma.hbm_to_vmem [thread:$0]  %s298_s0, 32, %s17_s10, [#allocation3]  }
   0xd   :  { %s229_s16 = scalar_lea.vmem %s26_s12, 2048  ;;  %p234_p6 = scmp.lt.s32.totalorder %s26_s12, %s26_s12 }
   0xe   :  { %p230_p5 = scmp.ne.s32.totalorder %s26_s12, %s229_s16  ;;  %p235_p7 = scmp.lt.s32.totalorder %s229_s16, %s229_s16 }
  0x10   :  { %p236_p8 = por %p235_p7, %p234_p6 }
  0x12   :  { %p237_p9 = pnand %p236_p8, %p230_p5 }
  0x14   :  { %240 = shalt.err (!%p237_p9)
}
  0x15   :  { %s269_s17 = smov 128   ;;  %s270_s18 = smov 8  }
  0x16   :  { %31 = dma.hbm_to_vmem [thread:$0]  %s299_s1, 2048, %s26_s12, [#allocation6], %s269_s17, %s269_s17, %s270_s18  }
  0x17   :  { %261 = dma.done.wait [#allocation3], 32  }
  0x18   :  { %262 = vsyncadd [#allocation3], 4294967264 }
  0x19   :  { %263 = dma.done.wait [#allocation6], 2048  }
  0x1a   :  { %264 = vsyncadd [#allocation6], 4294965248  ;;  %v271_v0 = vmov 0.0   ;;  %vm272_vm0 = vmmov 0   ;;  %v54_v1 = vld [vmem:[#allocation5 + $0x78] sm:$0xff]  ;;  %v53_v2 = vld [vmem:[#allocation5 + $0x70] sm:$0xff] }
  0x1b   :  { %159 = vmatprep.subr.mxu0 %v271_v0  ;;  %191 = vmatprep.mubr.msk.f32.mxu0 %vm272_vm0, %v271_v0  ;;  %v52_v3 = vld [vmem:[#allocation5 + $0x68] sm:$0xff]  ;;  %v51_v4 = vld [vmem:[#allocation5 + $0x60] sm:$0xff]  ;;  %v50_v5 = vld [vmem:[#allocation5 + $0x58] sm:$0xff]  ;;  %s273_s0 = smov [#allocation7]  }
  0x1c   :  { %160 = vmatpush3.msra.mxu0 %v54_v1  ;;  %v49_v6 = vld [vmem:[#allocation5 + $0x50] sm:$0xff]  ;;  %v48_v7 = vld [vmem:[#allocation5 + $0x48] sm:$0xff]  ;;  %v47_v8 = vld [vmem:[#allocation5 + $0x40] sm:$0xff]  ;;  %s132_s1 = sshll.u32 %s273_s0, 4  ;;  %s133_s1 = int_to_ptr.vmem [resolvable:$true] %s132_s1 }
  0x1d   :  { %161 = vmatprep.subr.mxu0 %v271_v0  ;;  %v46_v9 = vld [vmem:[#allocation5 + $0x38] sm:$0xff]  ;;  %v45_v10 = vld [vmem:[#allocation5 + $0x30] sm:$0xff]  ;;  %v44_v11 = vld [vmem:[#allocation5 + $0x28] sm:$0xff]  ;;  %s241_s21 = scalar_lea.vmem %s133_s1, 32  ;;  %p246_p11 = scmp.lt.s32.totalorder %s133_s1, %s133_s1 }
  0x1e   :  { %162 = vmatpush3.msra.mxu0 %v53_v2  ;;  %v43_v12 = vld [vmem:[#allocation5 + $0x20] sm:$0xff]  ;;  %v42_v13 = vld [vmem:[#allocation5 + $0x18] sm:$0xff]  ;;  %v41_v14 = vld [vmem:[#allocation5 + $0x10] sm:$0xff]  ;;  %p242_p10 = scmp.ne.s32.totalorder %s133_s1, %s241_s21  ;;  %p247_p12 = scmp.lt.s32.totalorder %s241_s21, %s241_s21 }
  0x1f   :  { %163 = vmatprep.subr.mxu0 %v271_v0  ;;  %v40_v15 = vld [vmem:[#allocation5 + $0x8] sm:$0xff]  ;;  %v39_v16 = vld [vmem:[#allocation5] sm:$0xff]  ;;  %v38_v17 = vld [vmem:[#allocation2] sm:$0x3] }
  0x20   :  { %164 = vmatpush3.msra.mxu0 %v52_v3  ;;  %p248_p13 = por %p247_p12, %p246_p11 }
  0x21   :  { %165 = vmatprep.subr.mxu0 %v271_v0 }
  0x22   :  { %166 = vmatpush3.msra.mxu0 %v51_v4  ;;  %p249_p0 = pnand %p248_p13, %p242_p10 }
  0x23   :  { %167 = vmatprep.subr.mxu0 %v271_v0 }
  0x24   :  { %168 = vmatpush3.msra.mxu0 %v50_v5 }
  0x25   :  { %169 = vmatprep.subr.mxu0 %v271_v0 }
  0x26   :  { %170 = vmatpush3.msra.mxu0 %v49_v6 }
  0x27   :  { %171 = vmatprep.subr.mxu0 %v271_v0 }
  0x28   :  { %172 = vmatpush3.msra.mxu0 %v48_v7 }
  0x29   :  { %173 = vmatprep.subr.mxu0 %v271_v0 }
  0x2a   :  { %174 = vmatpush3.msra.mxu0 %v47_v8 }
  0x2b   :  { %175 = vmatprep.subr.mxu0 %v271_v0 }
  0x2c   :  { %176 = vmatpush3.msra.mxu0 %v46_v9 }
  0x2d   :  { %177 = vmatprep.subr.mxu0 %v271_v0 }
  0x2e   :  { %178 = vmatpush3.msra.mxu0 %v45_v10 }
  0x2f   :  { %179 = vmatprep.subr.mxu0 %v271_v0 }
  0x30   :  { %180 = vmatpush3.msra.mxu0 %v44_v11 }
  0x31   :  { %181 = vmatprep.subr.mxu0 %v271_v0 }
  0x32   :  { %182 = vmatpush3.msra.mxu0 %v43_v12 }
  0x33   :  { %183 = vmatprep.subr.mxu0 %v271_v0 }
  0x34   :  { %184 = vmatpush3.msra.mxu0 %v42_v13 }
  0x35   :  { %185 = vmatprep.subr.mxu0 %v271_v0 }
  0x36   :  { %186 = vmatpush3.msra.mxu0 %v41_v14 }
  0x37   :  { %187 = vmatprep.subr.mxu0 %v271_v0 }
  0x38   :  { %188 = vmatpush3.msra.mxu0 %v40_v15 }
  0x39   :  { %189 = vmatprep.subr.mxu0 %v271_v0 }
  0x3a   :  { %190 = vmatpush3.msra.mxu0 %v39_v16 }
  0x3b   :  { %192 = vmatmul.mubr.f32.vlgmr.msra.gmra.mxu0 %v38_v17 }
  0xfb   :  { %v121_v18 = vpop.f32.mrf.mxu0 }
  0xfc   :  { %125 = vst [vmem:[#allocation7] sm:$0x3] %v121_v18 }
  0xfd   :  { %v193_v19 = vpop.f32.mrf.mxu0 }
  0xfe   :  { %252 = shalt.err (!%p249_p0)
}
  0xff   :  { %135 = dma.vmem_to_hbm [thread:$0]  %s133_s1, 32, %s300_s2, [#allocation4]  }
 0x100   :  { %265 = dma.done.wait [#allocation4], 32  }
 0x101   :  { %266 = vsyncadd [#allocation4], 4294967264 }
 0x102   :  { %139 = vsyncpa [#allocation3], 1 }
 0x103   :  { %140 = vsyncpa [#allocation6], 1 }
 0x104   :  { %141 = vsyncpa [#allocation4], 1 }

</bundles_post_ra>
